<compile_context>
chip_gen: v5e
topology: v5e:2x2
jax: 0.10.0
libtpu: 0.0.40
codegen_flags: <defaults>
</compile_context>

<pallas_src>
import math

import jax
import jax.numpy as jnp
from jax import lax
from jax.experimental import pallas as pl
from jax.experimental.pallas import tpu as pltpu


def _coattention_kernel(head_size, matmul_dtype=None):
    scale = 1.0 / math.sqrt(head_size)

    def kernel(s1_ref, s2_ref, mask_ref, wq_ref, bq_ref, wk_ref, bk_ref,
               wv_ref, bv_ref, out_ref):
        s1 = s1_ref[0]            # (S1, H)
        s2 = s2_ref[0]            # (S2, H)
        mask = mask_ref[0, 0]     # (1, S2) -> broadcasts over query rows

        wq = wq_ref[0]            # (H, d)  -- this head's weight slice
        wk = wk_ref[0]
        wv = wv_ref[0]
        bq = bq_ref[0]            # (1, d)
        bk = bk_ref[0]
        bv = bv_ref[0]

        # Per-head projections: full-H contraction on the MXU, f32 accumulate.
        # Softmax scale is folded into Q once (an (S1, d) multiply).
        q = (jnp.dot(s1, wq, preferred_element_type=jnp.float32) + bq) * scale
        k = jnp.dot(s2, wk, preferred_element_type=jnp.float32) + bk
        v = jnp.dot(s2, wv, preferred_element_type=jnp.float32) + bv

        if matmul_dtype is not None:            # e.g. bf16 MXU operands on v6e/v7x
            q = q.astype(matmul_dtype)
            k = k.astype(matmul_dtype)
            v = v.astype(matmul_dtype)

        # scores = q @ k^T without an explicit transpose: contract d of both.
        scores = lax.dot_general(
            q, k, dimension_numbers=(((1,), (1,)), ((), ())),
            preferred_element_type=jnp.float32)
        scores = scores + mask                  # (S1, S2) + (1, S2), added once

        # Numerically-stable softmax in f32; the divide is fused into the
        # PV epilogue (an (S1, d) multiply) via the approximate EUP reciprocal.
        m = jnp.max(scores, axis=-1, keepdims=True)
        e = jnp.exp(scores - m)
        denom = jnp.sum(e, axis=-1, keepdims=True)

        ctx = jnp.dot(e.astype(v.dtype), v, preferred_element_type=jnp.float32)
        ctx = ctx * pl.reciprocal(denom, approx=True)      # (S1, d)

        out_ref[0, 0] = ctx.astype(out_ref.dtype)

    return kernel


def bert_co_attention(s1_hidden, s2_hidden, s2_mask, params, num_heads,
                      matmul_dtype=None):
    """s1_hidden: (B, S1, H); s2_hidden: (B, S2, H); s2_mask: (B, 1, 1, S2)."""
    B, S1, H = s1_hidden.shape
    _, S2, _ = s2_hidden.shape
    d = H // num_heads

    # Head-major parameter views (done once, outside the kernel, on HBM) so
    # each grid step DMAs only its own head's (H, d) / (1, d) slice.
    def split_w(w):   # (H, H) [in, out] -> (NH, H, d)
        return w.reshape(H, num_heads, d).transpose(1, 0, 2)

    def split_b(b):   # (1, H) -> (NH, 1, d)
        return b.reshape(num_heads, d)[:, None, :]

    wq, bq = split_w(params["wq"]), split_b(params["bq"])
    wk, bk = split_w(params["wk"]), split_b(params["bk"])
    wv, bv = split_w(params["wv"]), split_b(params["bv"])

    kernel = _coattention_kernel(d, matmul_dtype)

    ctx = pl.pallas_call(
        kernel,
        out_shape=jax.ShapeDtypeStruct((B, num_heads, S1, d), s1_hidden.dtype),
        grid_spec=pltpu.PrefetchScalarGridSpec(
            num_scalar_prefetch=0,
            # b outer, h inner: s1/s2/mask block indices are unchanged across
            # the inner head axis, so those tiles stay resident in VMEM.
            grid=(B, num_heads),
            in_specs=[
                pl.BlockSpec((1, S1, H), lambda b, h: (b, 0, 0)),        # s1
                pl.BlockSpec((1, S2, H), lambda b, h: (b, 0, 0)),        # s2
                pl.BlockSpec((1, 1, 1, S2), lambda b, h: (b, 0, 0, 0)),  # mask
                pl.BlockSpec((1, H, d), lambda b, h: (h, 0, 0)),         # Wq[h]
                pl.BlockSpec((1, 1, d), lambda b, h: (h, 0, 0)),         # bq[h]
                pl.BlockSpec((1, H, d), lambda b, h: (h, 0, 0)),         # Wk[h]
                pl.BlockSpec((1, 1, d), lambda b, h: (h, 0, 0)),         # bk[h]
                pl.BlockSpec((1, H, d), lambda b, h: (h, 0, 0)),         # Wv[h]
                pl.BlockSpec((1, 1, d), lambda b, h: (h, 0, 0)),         # bv[h]
            ],
            out_specs=pl.BlockSpec((1, 1, S1, d), lambda b, h: (b, h, 0, 0)),
        ),
        compiler_params=pltpu.CompilerParams(
            dimension_semantics=("parallel", "parallel")),
    )(s1_hidden, s2_hidden, s2_mask, wq, bq, wk, bk, wv, bv)

    # permute(0, 2, 1, 3) + view(..., all_head_size): head merge outside the
    # kernel (cheap XLA op), exactly as in the PyTorch module.
    return ctx.transpose(0, 2, 1, 3).reshape(B, S1, H)


def _reference(s1, s2, mask, params, num_heads):
    """Plain-JAX reference mirroring the PyTorch forward (eval mode)."""
    B, S1, H = s1.shape
    _, S2, _ = s2.shape
    d = H // num_heads

    def lin(x, w, b):
        return x @ w + b  # w already (in, out)

    q = lin(s1, params["wq"], params["bq"]).reshape(B, S1, num_heads, d).transpose(0, 2, 1, 3)
    k = lin(s2, params["wk"], params["bk"]).reshape(B, S2, num_heads, d).transpose(0, 2, 1, 3)
    v = lin(s2, params["wv"], params["bv"]).reshape(B, S2, num_heads, d).transpose(0, 2, 1, 3)

    scores = jnp.einsum("bhqd,bhkd->bhqk", q, k) / math.sqrt(d) + mask
    probs = jax.nn.softmax(scores, axis=-1)
    ctx = jnp.einsum("bhqk,bhkd->bhqd", probs, v)
    return ctx.transpose(0, 2, 1, 3).reshape(B, S1, H)


if __name__ == "__main__":
    # Config: hidden_size=32, num_attention_heads=4 -> head_size=8
    B, S1, S2, H, NH = 2, 8, 8, 32, 4

    key = jax.random.PRNGKey(0)
    ks = jax.random.split(key, 10)

    s1_hidden = jax.random.normal(ks[0], (B, S1, H), dtype=jnp.float32)
    s2_hidden = jax.random.normal(ks[1], (B, S2, H), dtype=jnp.float32)

    # BERT-style extended attention mask: 0 for keep, -10000 for masked keys.
    keep = (jax.random.uniform(ks[2], (B, S2)) > 0.25).astype(jnp.float32)
    s2_attention_mask = ((1.0 - keep) * -10000.0).reshape(B, 1, 1, S2)

    # Deterministic parameter init (nn.Linear: weight (out, in), bias (out,)).
    # Stored pre-transposed as (in, out); biases as (1, out).
    def init_linear(kw, kb):
        w = jax.random.normal(kw, (H, H), dtype=jnp.float32) * 0.05
        b = jax.random.normal(kb, (1, H), dtype=jnp.float32) * 0.05
        return w, b

    wq, bq = init_linear(ks[3], ks[4])
    wk, bk = init_linear(ks[5], ks[6])
    wv, bv = init_linear(ks[7], ks[8])
    params = {"wq": wq, "bq": bq, "wk": wk, "bk": bk, "wv": wv, "bv": bv}

    # matmul_dtype=None keeps MXU operands in the input dtype (f32 here) so the
    # tight reference check passes; pass jnp.bfloat16 on v6e/v7x for speed.
    out = bert_co_attention(s1_hidden, s2_hidden, s2_attention_mask, params, NH,
                            matmul_dtype=None)
    out = jax.block_until_ready(out)

    ref = _reference(s1_hidden, s2_hidden, s2_attention_mask, params, NH)
    assert out.shape == (B, S1, H)
    # Tolerance covers pl.reciprocal(approx=True) (~2^-12 relative error).
    assert jnp.allclose(out, ref, atol=2e-3, rtol=2e-3), "mismatch vs reference"

    print("KERNEL_OK")
</pallas_src>

<mosaic_0001>
module attributes {stable_mosaic.version = 11 : i64} {
  func.func @kernel(%arg0: i32, %arg1: i32, %arg2: memref<1x8x32xf32, #tpu.memory_space<vmem>>, %arg3: memref<1x8x32xf32, #tpu.memory_space<vmem>>, %arg4: memref<1x1x1x8xf32, #tpu.memory_space<vmem>>, %arg5: memref<1x32x8xf32, #tpu.memory_space<vmem>>, %arg6: memref<1x1x8xf32, #tpu.memory_space<vmem>>, %arg7: memref<1x32x8xf32, #tpu.memory_space<vmem>>, %arg8: memref<1x1x8xf32, #tpu.memory_space<vmem>>, %arg9: memref<1x32x8xf32, #tpu.memory_space<vmem>>, %arg10: memref<1x1x8xf32, #tpu.memory_space<vmem>>, %arg11: memref<1x1x8x8xf32, #tpu.memory_space<vmem>>) attributes {dimension_semantics = [#tpu.dimension_semantics<parallel>, #tpu.dimension_semantics<parallel>], iteration_bounds = array<i64: 2, 4>, scalar_prefetch = 0 : i64, scratch_operands = 0 : i64, tpu.core_type = #tpu.core_type<tc>, window_params = [{transform_indices = @transform_0, window_bounds = array<i64: 1, 8, 32>}, {transform_indices = @transform_1, window_bounds = array<i64: 1, 8, 32>}, {transform_indices = @transform_2, window_bounds = array<i64: 1, 1, 1, 8>}, {transform_indices = @transform_3, window_bounds = array<i64: 1, 32, 8>}, {transform_indices = @transform_4, window_bounds = array<i64: 1, 1, 8>}, {transform_indices = @transform_5, window_bounds = array<i64: 1, 32, 8>}, {transform_indices = @transform_6, window_bounds = array<i64: 1, 1, 8>}, {transform_indices = @transform_7, window_bounds = array<i64: 1, 32, 8>}, {transform_indices = @transform_8, window_bounds = array<i64: 1, 1, 8>}, {transform_indices = @transform_9, window_bounds = array<i64: 1, 1, 8, 8>}]} {
    %c0 = arith.constant 0 : index
    %c0_0 = arith.constant 0 : index
    %c0_1 = arith.constant 0 : index
    %0 = vector.load %arg2[%c0, %c0_0, %c0_1] : memref<1x8x32xf32, #tpu.memory_space<vmem>>, vector<1x8x32xf32>
    %1 = vector.shape_cast %0 : vector<1x8x32xf32> to vector<8x32xf32>
    %c0_2 = arith.constant 0 : index
    %c0_3 = arith.constant 0 : index
    %c0_4 = arith.constant 0 : index
    %2 = vector.load %arg3[%c0_2, %c0_3, %c0_4] : memref<1x8x32xf32, #tpu.memory_space<vmem>>, vector<1x8x32xf32>
    %3 = vector.shape_cast %2 : vector<1x8x32xf32> to vector<8x32xf32>
    %c0_5 = arith.constant 0 : index
    %c0_6 = arith.constant 0 : index
    %c0_7 = arith.constant 0 : index
    %c0_8 = arith.constant 0 : index
    %4 = vector.load %arg4[%c0_5, %c0_6, %c0_7, %c0_8] : memref<1x1x1x8xf32, #tpu.memory_space<vmem>>, vector<1x1x1x8xf32>
    %5 = vector.shape_cast %4 : vector<1x1x1x8xf32> to vector<1x8xf32>
    %c0_9 = arith.constant 0 : index
    %c0_10 = arith.constant 0 : index
    %c0_11 = arith.constant 0 : index
    %6 = vector.load %arg5[%c0_9, %c0_10, %c0_11] : memref<1x32x8xf32, #tpu.memory_space<vmem>>, vector<1x32x8xf32>
    %7 = vector.shape_cast %6 : vector<1x32x8xf32> to vector<32x8xf32>
    %c0_12 = arith.constant 0 : index
    %c0_13 = arith.constant 0 : index
    %c0_14 = arith.constant 0 : index
    %8 = vector.load %arg7[%c0_12, %c0_13, %c0_14] : memref<1x32x8xf32, #tpu.memory_space<vmem>>, vector<1x32x8xf32>
    %9 = vector.shape_cast %8 : vector<1x32x8xf32> to vector<32x8xf32>
    %c0_15 = arith.constant 0 : index
    %c0_16 = arith.constant 0 : index
    %c0_17 = arith.constant 0 : index
    %10 = vector.load %arg9[%c0_15, %c0_16, %c0_17] : memref<1x32x8xf32, #tpu.memory_space<vmem>>, vector<1x32x8xf32>
    %11 = vector.shape_cast %10 : vector<1x32x8xf32> to vector<32x8xf32>
    %c0_18 = arith.constant 0 : index
    %c0_19 = arith.constant 0 : index
    %c0_20 = arith.constant 0 : index
    %12 = vector.load %arg6[%c0_18, %c0_19, %c0_20] : memref<1x1x8xf32, #tpu.memory_space<vmem>>, vector<1x1x8xf32>
    %13 = vector.shape_cast %12 : vector<1x1x8xf32> to vector<1x8xf32>
    %c0_21 = arith.constant 0 : index
    %c0_22 = arith.constant 0 : index
    %c0_23 = arith.constant 0 : index
    %14 = vector.load %arg8[%c0_21, %c0_22, %c0_23] : memref<1x1x8xf32, #tpu.memory_space<vmem>>, vector<1x1x8xf32>
    %15 = vector.shape_cast %14 : vector<1x1x8xf32> to vector<1x8xf32>
    %c0_24 = arith.constant 0 : index
    %c0_25 = arith.constant 0 : index
    %c0_26 = arith.constant 0 : index
    %16 = vector.load %arg10[%c0_24, %c0_25, %c0_26] : memref<1x1x8xf32, #tpu.memory_space<vmem>>, vector<1x1x8xf32>
    %17 = vector.shape_cast %16 : vector<1x1x8xf32> to vector<1x8xf32>
    %cst = arith.constant dense<0.000000e+00> : vector<8x8xf32>
    %18 = tpu.matmul %1, %7, %cst {dimension_numbers = #tpu.dot_dimension_numbers<[1], [0], [0], [1], [0, 0, 1, 1], [], []>} : vector<8x32xf32>, vector<32x8xf32>, vector<8x8xf32> -> vector<8x8xf32>
    %19 = vector.broadcast %13 : vector<1x8xf32> to vector<8x8xf32>
    %20 = arith.addf %18, %19 : vector<8x8xf32>
    %cst_27 = arith.constant 0.353553385 : f32
    %21 = vector.broadcast %cst_27 : f32 to vector<8x8xf32>
    %22 = arith.mulf %20, %21 : vector<8x8xf32>
    %cst_28 = arith.constant dense<0.000000e+00> : vector<8x8xf32>
    %23 = tpu.matmul %3, %9, %cst_28 {dimension_numbers = #tpu.dot_dimension_numbers<[1], [0], [0], [1], [0, 0, 1, 1], [], []>} : vector<8x32xf32>, vector<32x8xf32>, vector<8x8xf32> -> vector<8x8xf32>
    %24 = vector.broadcast %15 : vector<1x8xf32> to vector<8x8xf32>
    %25 = arith.addf %23, %24 : vector<8x8xf32>
    %cst_29 = arith.constant dense<0.000000e+00> : vector<8x8xf32>
    %26 = tpu.matmul %3, %11, %cst_29 {dimension_numbers = #tpu.dot_dimension_numbers<[1], [0], [0], [1], [0, 0, 1, 1], [], []>} : vector<8x32xf32>, vector<32x8xf32>, vector<8x8xf32> -> vector<8x8xf32>
    %27 = vector.broadcast %17 : vector<1x8xf32> to vector<8x8xf32>
    %28 = arith.addf %26, %27 : vector<8x8xf32>
    %cst_30 = arith.constant dense<0.000000e+00> : vector<8x8xf32>
    %29 = tpu.matmul %22, %25, %cst_30 {dimension_numbers = #tpu.dot_dimension_numbers<[1], [1], [0], [0], [0, 0, 1, 0], [], []>} : vector<8x8xf32>, vector<8x8xf32>, vector<8x8xf32> -> vector<8x8xf32>
    %30 = vector.broadcast %5 : vector<1x8xf32> to vector<8x8xf32>
    %31 = arith.addf %29, %30 : vector<8x8xf32>
    %cst_31 = arith.constant dense<0xFF800000> : vector<8xf32>
    %32 = vector.multi_reduction <maximumf>, %31, %cst_31 [1] : vector<8x8xf32> to vector<8xf32>
    %33 = vector.shape_cast %32 : vector<8xf32> to vector<8x1xf32>
    %34 = vector.broadcast %33 : vector<8x1xf32> to vector<8x8xf32>
    %35 = arith.subf %31, %34 : vector<8x8xf32>
    %36 = math.exp %35 : vector<8x8xf32>
    %cst_32 = arith.constant dense<0.000000e+00> : vector<8xf32>
    %37 = vector.multi_reduction <add>, %36, %cst_32 [1] : vector<8x8xf32> to vector<8xf32>
    %38 = vector.shape_cast %37 : vector<8xf32> to vector<8x1xf32>
    %cst_33 = arith.constant dense<0.000000e+00> : vector<8x8xf32>
    %39 = tpu.matmul %36, %28, %cst_33 {dimension_numbers = #tpu.dot_dimension_numbers<[1], [0], [0], [1], [0, 0, 1, 1], [], []>} : vector<8x8xf32>, vector<8x8xf32>, vector<8x8xf32> -> vector<8x8xf32>
    %40 = tpu.reciprocal %38 {approx = true} : vector<8x1xf32> -> vector<8x1xf32>
    %41 = vector.broadcast %40 : vector<8x1xf32> to vector<8x8xf32>
    %42 = arith.mulf %39, %41 : vector<8x8xf32>
    %c0_34 = arith.constant 0 : index
    %c0_35 = arith.constant 0 : index
    %c0_36 = arith.constant 0 : index
    %c0_37 = arith.constant 0 : index
    %43 = vector.load %arg11[%c0_34, %c0_35, %c0_36, %c0_37] : memref<1x1x8x8xf32, #tpu.memory_space<vmem>>, vector<1x1x8x8xf32>
    %44 = vector.shape_cast %43 : vector<1x1x8x8xf32> to vector<8x8xf32>
    %45 = vector.shape_cast %42 : vector<8x8xf32> to vector<1x1x8x8xf32>
    tpu.vector_store %arg11[%c0_34, %c0_35, %c0_36, %c0_37], %45 {strides = array<i32>} : memref<1x1x8x8xf32, #tpu.memory_space<vmem>>, vector<1x1x8x8xf32>,
    return
  }
  func.func @transform_0(%arg0: i32, %arg1: i32) -> (i32, i32, i32) {
    %c0_i32 = arith.constant 0 : i32
    %c0_i32_0 = arith.constant 0 : i32
    %c0_i32_1 = arith.constant 0 : i32
    return %arg0, %c0_i32, %c0_i32_0 : i32, i32, i32
  }
  func.func @transform_1(%arg0: i32, %arg1: i32) -> (i32, i32, i32) {
    %c0_i32 = arith.constant 0 : i32
    %c0_i32_0 = arith.constant 0 : i32
    %c0_i32_1 = arith.constant 0 : i32
    return %arg0, %c0_i32, %c0_i32_0 : i32, i32, i32
  }
  func.func @transform_2(%arg0: i32, %arg1: i32) -> (i32, i32, i32, i32) {
    %c0_i32 = arith.constant 0 : i32
    %c0_i32_0 = arith.constant 0 : i32
    %c0_i32_1 = arith.constant 0 : i32
    %c0_i32_2 = arith.constant 0 : i32
    return %arg0, %c0_i32, %c0_i32_0, %c0_i32_1 : i32, i32, i32, i32
  }
  func.func @transform_3(%arg0: i32, %arg1: i32) -> (i32, i32, i32) {
    %c0_i32 = arith.constant 0 : i32
    %c0_i32_0 = arith.constant 0 : i32
    %c0_i32_1 = arith.constant 0 : i32
    return %arg1, %c0_i32, %c0_i32_0 : i32, i32, i32
  }
  func.func @transform_4(%arg0: i32, %arg1: i32) -> (i32, i32, i32) {
    %c0_i32 = arith.constant 0 : i32
    %c0_i32_0 = arith.constant 0 : i32
    %c0_i32_1 = arith.constant 0 : i32
    return %arg1, %c0_i32, %c0_i32_0 : i32, i32, i32
  }
  func.func @transform_5(%arg0: i32, %arg1: i32) -> (i32, i32, i32) {
    %c0_i32 = arith.constant 0 : i32
    %c0_i32_0 = arith.constant 0 : i32
    %c0_i32_1 = arith.constant 0 : i32
    return %arg1, %c0_i32, %c0_i32_0 : i32, i32, i32
  }
  func.func @transform_6(%arg0: i32, %arg1: i32) -> (i32, i32, i32) {
    %c0_i32 = arith.constant 0 : i32
    %c0_i32_0 = arith.constant 0 : i32
    %c0_i32_1 = arith.constant 0 : i32
    return %arg1, %c0_i32, %c0_i32_0 : i32, i32, i32
  }
  func.func @transform_7(%arg0: i32, %arg1: i32) -> (i32, i32, i32) {
    %c0_i32 = arith.constant 0 : i32
    %c0_i32_0 = arith.constant 0 : i32
    %c0_i32_1 = arith.constant 0 : i32
    return %arg1, %c0_i32, %c0_i32_0 : i32, i32, i32
  }
  func.func @transform_8(%arg0: i32, %arg1: i32) -> (i32, i32, i32) {
    %c0_i32 = arith.constant 0 : i32
    %c0_i32_0 = arith.constant 0 : i32
    %c0_i32_1 = arith.constant 0 : i32
    return %arg1, %c0_i32, %c0_i32_0 : i32, i32, i32
  }
  func.func @transform_9(%arg0: i32, %arg1: i32) -> (i32, i32, i32, i32) {
    %c0_i32 = arith.constant 0 : i32
    %c0_i32_0 = arith.constant 0 : i32
    %c0_i32_1 = arith.constant 0 : i32
    return %arg0, %arg1, %c0_i32, %c0_i32_0 : i32, i32, i32, i32
  }
}

</mosaic_0001>

<bundles_post_ra>
// kernel: tpu_custom_call.1
= control target key start
LH: loop header
LB: loop body
LE: loop exit
PB: predicated region body
PF: predicated region fallthrough
CT: control target
= control target key end

     0   :  { %s1237_s0 = inlined_call_operand.vmem [shape: f32[2,8,32], index: 0, kind: input, shape index: {}]   ;;  %s1238_s1 = inlined_call_operand.vmem [shape: f32[2,8,32], index: 1, kind: input, shape index: {}]   ;;  %s1239_s2 = inlined_call_operand.vmem [shape: f32[2,1,1,8], index: 2, kind: input, shape index: {}]   ;;  %s1240_s3 = inlined_call_operand.vmem [shape: f32[4,32,8], index: 3, kind: input, shape index: {}]   ;;  %s1241_s4 = inlined_call_operand.vmem [shape: f32[4,1,8], index: 4, kind: input, shape index: {}]   ;;  %s1242_s5 = inlined_call_operand.vmem [shape: f32[4,32,8], index: 5, kind: input, shape index: {}]   ;;  %s1243_s6 = inlined_call_operand.vmem [shape: f32[4,1,8], index: 6, kind: input, shape index: {}]   ;;  %s1244_s7 = inlined_call_operand.vmem [shape: f32[4,32,8], index: 7, kind: input, shape index: {}]   ;;  %s1245_s8 = inlined_call_operand.vmem [shape: f32[4,1,8], index: 8, kind: input, shape index: {}]   ;;  %s1246_s9 = inlined_call_operand.hbm [shape: f32[2,4,8,8], index: 9, kind: output, shape index: {}]  }
   0x1   :  { %1251 = sst [smem:[#allocation10_spill]] %s1240_s3 }
   0x2   :  { %1252 = sst [smem:[#allocation11_spill]] %s1242_s5 }
   0x3   :  { %14 = vsyncpa [#allocation3], 0 }
   0x4   :  { %16 = vsyncpa [#allocation3 + $0x1], 0  ;;  %s1062_s30 = smov 0   ;;  %s1064_s10 = smov 0  }
   0x5   :  { %s1066_s11 = smov 0   ;;  %s1068_s12 = smov 0  }
   0x6   :  { %s1070_s13 = smov 0   ;;  %s1072_s14 = smov 0  }
   0x7   :  { %s1074_s15 = smov 0   ;;  %s1076_s16 = smov 0  }
   0x8 LB: > { %1253 = sst [smem:[#allocation5_spill]] %s1002_s14  ;;  %s809_s17 = sadd.s32 4294967295, %s1010_s16   ;;  %s1010_s16 = sphi %s1076_s16, %s22_s16   ;;  %s1006_s15 = sphi %s1074_s15, %s1267_s15   ;;  %s1002_s14 = sphi %s1072_s14, %s1266_s14   ;;  %s998_s13 = sphi %s1070_s13, %s1265_s13   ;;  %s994_s12 = sphi %s1068_s12, %s1264_s12   ;;  %s990_s11 = sphi %s1066_s11, %s1270_s11   ;;  %s986_s10 = sphi %s1064_s10, %s1269_s10   ;;  %s982_s30 = sphi %s1062_s30, %s1268_s30  }
   0x9   : > { %1254 = sst [smem:[#allocation6_spill]] %s1006_s15  ;;  %s810_s18 = sadd.s32 4294967294, %s1010_s16  }
   0xa   : > { %s31_s19 = sadd.s32 1, %s1002_s14  ;;  %s34_s20 = sadd.s32 1, %s1006_s15 }
   0xb   : > { %p32_p0 = scmp.ge.s32.totalorder %s31_s19, 4  ;;  %p287_p1 = scmp.ne.s32.totalorder %s990_s11, %s986_s10 }
   0xc   : > { %p288_p2 = scmp.eq.s32.totalorder %s809_s17, 7  ;;  %p293_p5 = scmp.ne.s32.totalorder %s986_s10, %s982_s30 }
   0xd   : > { %s1272_s19 = smov (%p32_p0, %s31_s19), 0  ;;  %s1274_s20 = smov (!%p32_p0, %s34_s20), %s1006_s15 }
   0xe   : > { %1255 = sst [smem:[#allocation7_spill]] %s1272_s19  ;;  %s273_s21 = ssub.s32 %s1002_s14, %s1272_s19 }
   0xf   : > { %p1113_p3 = por %p288_p2, %p287_p1  ;;  %p36_p4 = scmp.ge.s32.totalorder %s1274_s20, 2 }
  0x10   : > { %p294_p6 = scmp.eq.s32.totalorder %s810_s18, 7  ;;  %p813_p7 = scmp.ge.s32.totalorder %s1010_s16, 1 }
  0x11   : > { %s1276_s20 = smov (%p36_p4, %s1274_s20), 0  ;;  %p374_p9 = scmp.lt.s32.totalorder %s1010_s16, 9 }
  0x12   : > { %1257 = sst [smem:[#allocation8_spill]] %s1276_s20  ;;  %p1122_p8 = por %p294_p6, %p293_p5 }
  0x13   : > { %s272_s24 = ssub.s32 %s1006_s15, %s1276_s20  ;;  %s277_s25 = sadd.s32 1, %s990_s11 }
  0x14   : > { %s274_s26 = sor.u32 %s273_s21, %s272_s24  ;;  %p375_p10 = pnand %p813_p7, %p374_p9 }
  0x15   : > { %p275_p11 = scmp.eq.s32.totalorder %s274_s26, 0  ;;  %p451_p12 = scmp.lt.s32.totalorder (!%p375_p10), %s994_s12, 3 }
  0x16   : > { %378 = sbr.rel (%p375_p10) target bundleno = 570 (0x23a), region = 56  ;;  %p440_p13 = scmp.lt.s32.totalorder (!%p375_p10), %s998_s13, 1 }
  0x17   : > { %s1131_s27 = scalar_select %p275_p11, %s990_s11, %s277_s25  }
  0x18   : > { %s1260_s5 = sld [smem:[#allocation11_spill]] (!%p375_p10) }
  0x19   : > { %1259 = sst [smem:[#allocation9_spill]] %s1131_s27 }
  0x1a   : > { %s1261_s3 = sld [smem:[#allocation10_spill]] (!%p375_p10) }
  0x1b   : > { %s1136_s28 = scalar_select %p451_p12, %s994_s12, 3  ;;  %vm496_vm0 = vcmask 261120   ;;  %vm573_vm1 = vcmask 64512  }
  0x1c   : > { %s1139_s29 = scalar_select %p440_p13, %s998_s13, 1 }
  0x1d   : > { %s1142_s17 = sshll.u32 %s1136_s28, 5  ;;  %s1262_s26 = scalar_lea.vmem %s1243_s6, %s1136_s28 }
  0x1e   : > { %s463_s20 = scalar_lea.vmem %s1260_s5, %s1142_s17  ;;  %s815_s27 = sshll.u32 %s1139_s29, 3  ;;  %v908_v14 = vld [vmem:[%s1262_s26] ss:$0 sm:$0xff] }
  0x1f   : > { %v485_v0 = vld [vmem:[%s463_s20 + $0x18] sm:$0xff]  ;;  %v484_v2 = vld [vmem:[%s463_s20 + $0x10] sm:$0xff]  ;;  %v483_v4 = vld [vmem:[%s463_s20 + $0x8] sm:$0xff]  ;;  %s447_s24 = scalar_lea.vmem %s1238_s1, %s815_s27  ;;  %s443_s15 = scalar_lea.vmem %s1237_s0, %s815_s27 }
  0x20   : > { %s455_s14 = scalar_lea.vmem %s1261_s3, %s1142_s17  ;;  %539 = vmatpush.msra.mxu1 %v485_v0  ;;  %v482_v6 = vld [vmem:[%s463_s20] sm:$0xff]  ;;  %s458_s5 = scalar_lea.vmem %s1241_s4, %s1136_s28 }
  0x21   : > { %v481_v1 = vld [vmem:[%s455_s14 + $0x18] sm:$0xff]  ;;  %v480_v3 = vld [vmem:[%s455_s14 + $0x10] sm:$0xff]  ;;  %v479_v5 = vld [vmem:[%s455_s14 + $0x8] sm:$0xff]  ;;  %s471_s3 = scalar_lea.vmem %s1244_s7, %s1142_s17 }
  0x22   : > { %512 = vmatpush.msra.mxu0 %v481_v1  ;;  %540 = vmatpush.msra.mxu1 %v484_v2  ;;  %v478_v7 = vld [vmem:[%s455_s14] sm:$0xff]  ;;  %s450_s14 = scalar_lea.vmem %s1239_s2, %s1139_s29  ;;  %v489_v10 = vld [vmem:[%s471_s3 + $0x18] sm:$0xff]  ;;  %v488_v11 = vld [vmem:[%s471_s3 + $0x10] sm:$0xff] }
  0x23   : > { %v476_v8 = vld [vmem:[%s447_s24] sm:$0xff]  ;;  %562 = vmatpush.msra.mxu2 %v489_v10  ;;  %v487_v12 = vld [vmem:[%s471_s3 + $0x8] sm:$0xff] }
  0x24   : > { %513 = vmatpush.msra.mxu0 %v480_v3  ;;  %541 = vmatpush.msra.mxu1 %v483_v4  ;;  %v475_v9 = vld [vmem:[%s443_s15] sm:$0xff]  ;;  %s474_s15 = scalar_lea.vmem %s1245_s8, %s1136_s28  ;;  %s437_s28 = sand.u32 1, %s986_s10  }
  0x25   : > { %563 = vmatpush.msra.mxu2 %v488_v11  ;;  %v486_v13 = vld [vmem:[%s471_s3] sm:$0xff]  ;;  %s814_s27 = sshll.u32 %s437_s28, 3 }
  0x26   : > { %514 = vmatpush.msra.mxu0 %v479_v5  ;;  %542 = vmatpush.msra.mxu1 %v482_v6  ;;  %v909_v15 = vld [vmem:[%s458_s5] ss:$0 sm:$0xff]  ;;  %s830_s5 = sshll.u32 %s998_s13, 2  ;;  %s439_s3 = scalar_lea.vmem [#allocation2], %s814_s27 }
  0x27   : > { %824 = vmatmul.msk.f32.vlgmr.msra.gmra.mxu1 %vm496_vm0, %v476_v8  ;;  %564 = vmatpush.msra.mxu2 %v487_v12  ;;  %v910_v21 = vld [vmem:[%s450_s14] ss:$0 sm:$0xff]  ;;  %s646_s19 = sadd.s32 %s994_s12, %s830_s5  ;;  %s650_s24 = sshll.u32 %s439_s3, 4  ;;  %s651_s24 = int_to_ptr.vmem [resolvable:$true] %s650_s24 }
  0x28   : > { %515 = vmatpush.msra.mxu0 %v478_v7  ;;  %v911_v25 = vld [vmem:[%s474_s15] ss:$0 sm:$0xff]  ;;  %s831_s18 = sshll.u32 %s646_s19, 3  ;;  %s636_s12 = scalar_lea.sflag [#allocation3], %s437_s28 }
  0x29   : > { %823 = vmatmul.msk.f32.vlgmr.msra.gmra.mxu0 %vm496_vm0, %v475_v9  ;;  %565 = vmatpush.msra.mxu2 %v486_v13  ;;  %s648_s21 = scalar_lea.hbm %s1246_s9, %s831_s18  ;;  %s936_s15 = scalar_lea.hbm %s1246_s9, 64 }
  0x2a   : > { %825 = vmatmul.msk.f32.vlgmr.msra.gmra.mxu2 %vm496_vm0, %v476_v8  ;;  %s652_s25 = sshll.u32 %s648_s21, 4  ;;  %s653_s25 = int_to_ptr.hbm [resolvable:$true] %s652_s25 }
  0x2b   : > { %s930_s13 = sshra.s32 %s653_s25, 4  ;;  %s931_s13 = int_to_ptr.hbm [resolvable:$true] %s930_s13 }
  0x2c   : > { %s932_s26 = scalar_lea.hbm %s931_s13, 8  ;;  %p937_p4 = scmp.lt.s32.totalorder %s931_s13, %s1246_s9 }
  0x2d   : > { %p933_p0 = scmp.ne.s32.totalorder %s931_s13, %s932_s26  ;;  %p938_p5 = scmp.lt.s32.totalorder %s936_s15, %s932_s26 }
  0x2f   : > { %p934_p1 = pnand %p933_p0, %p1113_p3  ;;  %p939_p6 = por %p938_p5, %p937_p4 }
  0x31   : > { %p935_p2 = pneg %p934_p1 }
  0x33   : > { %p940_p7 = pnand %p939_p6, %p935_p2 }
  0xa4   : > { %v544_v16 = vpop.f32.mrf.mxu1 }
  0xa5   : > { %v545_v18 = vadd.f32 %v908_v14, %v544_v16 }
  0xa6   : > { %v517_v17 = vpop.f32.mrf.mxu0 }
  0xa7   : > { %v518_v19 = vadd.f32 %v909_v15, %v517_v17  ;;  %826 = vmatpush.xpose.msk.msra.mxu3 %vm573_vm1, %v545_v18 }
  0xa9   : > { %v520_v20 = vmul.f32 0.35355338, %v518_v19 }
  0xab   : > { %827 = vmatmul.msk.f32.vlgmr.msra.gmra.mxu3 %vm573_vm1, %v520_v20 }
  0xad   : > { %v567_v26 = vpop.f32.mrf.mxu2 }
  0xae   : > { %v568_v27 = vadd.f32 %v911_v25, %v567_v26 }
  0xb0   : > { %627 = vmatpush.msrb.mxu3 %v568_v27 }
 0x12e   : > { %v597_v22 = vpop.f32.mrf.mxu3 }
 0x12f   : > { %v598_v23 = vadd.f32 %v910_v21, %v597_v22 }
 0x131   : > { %v600_v24 = vsel %vm573_vm1, %v598_v23, -inf }
 0x132   : > { %601 = vmax.xlane.f32.xlu0 %v600_v24 }
 0x1a5   : > { %v602_v28 = vpop.xlane.xlu0 %601 }
 0x1a6   : > { %v603_v29 = vsub.f32 %v598_v23, %v602_v28 }
 0x1a8   : > { %v604_v30 = vmul.f32 1.442695, %v603_v29 }
 0x1aa   : > { %912 = vpow2.f32 %v604_v30 }
 0x1b0   : > { %v913_v31 = vpop.eup %912 }
 0x1b1   : > { %828 = vmatmul.msk.f32.vlgmr.msrb.gmra.mxu3 %vm573_vm1, %v913_v31  ;;  %v606_v32 = vsel %vm573_vm1, %v913_v31, 0.0 }
 0x1b2   : > { %607 = vadd.xlane.f32.xlu0 %v606_v32 }
 0x225   : > { %v608_v33 = vpop.xlane.xlu0 %607 }
 0x226   : > { %914 = vrcp.f32 %v608_v33 }
 0x22c   : > { %v915_v34 = vpop.eup %914 }
 0x234   : > { %v629_v35 = vpop.f32.mrf.mxu3 }
 0x235   : > { %v633_v36 = vmul.f32 %v915_v34, %v629_v35 }
 0x237   : > { %634 = vst.msk [vmem:[%s439_s3] sm:$0xff] %vm573_vm1, %v633_v36 }
 0x238   : > { %943 = shalt.err (!%p940_p7)
}
 0x239   : > { %837 = dma.vmem_to_hbm [thread:$0]  (%p1113_p3), %s651_s24, 128, %s653_s25, %s636_s12  }
 0x23a PF: > { %p843_p9 = scmp.ge.s32.totalorder %s1010_s16, 2  ;;  %s664_s28 = sand.u32 1, %s982_s30  }
 0x23b   : > { %s665_s27 = scalar_lea.sflag [#allocation3], %s664_s28 }
 0x23c   : > { %p840_p10 = pnand %p843_p9, %p1122_p8 }
 0x23e   : > { %p841_p11 = pneg %p840_p10 }
 0x240   : > { %977 = dma.done.wait (%p841_p11), %s665_s27, 128  }
 0x241   : > { %979 = vsyncadd (%p841_p11), %s665_s27, 4294967168  ;;  %s22_s16 = sadd.s32 1, %s1010_s16   ;;  %s1263_s18 = sld [smem:[#allocation9_spill]] }
 0x242   : > { %p19_p12 = scmp.ge.s32.totalorder %s22_s16, 10   ;;  %s1264_s12 = sld [smem:[#allocation5_spill]] }
 0x243   : > { %s1265_s13 = sld [smem:[#allocation6_spill]]  ;;  %s1268_s30 = smov %s986_s10 }
 0x244   : > { %s1266_s14 = sld [smem:[#allocation7_spill]]  ;;  %s1269_s10 = smov %s990_s11 }
 0x245   : > { %s1267_s15 = sld [smem:[#allocation8_spill]]  ;;  %21 = sbr.rel (!%p19_p12) target bundleno = 8 (0x8), region = 115 }
 0x247   : > { %s1270_s11 = smov %s1263_s18 }
 0x24a   :  { %671 = vsyncpa [#allocation3], 1 }
 0x24b   :  { %673 = vsyncpa [#allocation3 + $0x1], 1 }

</bundles_post_ra>
